<compile_context>
chip_gen: v7x
topology: tpu7x:2x2x1
jax: 0.10.0
libtpu: 0.0.40
codegen_flags: <defaults>
</compile_context>

<pallas_src>
import functools

import jax
import jax.numpy as jnp
from jax import lax
from jax.experimental import pallas as pl
from jax.experimental.pallas import tpu as pltpu

_EPS = 1e-5


# ---------------------------------------------------------------------------
# Hardware-aware budgets & tiling helpers
# ---------------------------------------------------------------------------
def _round_up(x, m):
    return ((x + m - 1) // m) * m


def _sublane_mult(dtype):
    # Sublane packing multiple: f32 -> 8, bf16 -> 16, int8/fp8 -> 32.
    return max(8, 32 // jnp.dtype(dtype).itemsize)


@functools.lru_cache(maxsize=None)
def _vmem_budgets():
    """Returns (vmem_limit_bytes, pipeline_block_budget_bytes), generation-aware."""
    cap = 64 * 1024 * 1024
    try:
        info = pltpu.get_tpu_info()
        cap = int(getattr(info, "vmem_capacity_bytes", cap))
    except Exception:
        pass
    if cap >= 128 * 1024 * 1024:          # v5e / v6e: 128 MiB physical VMEM
        return 96 * 1024 * 1024, 48 * 1024 * 1024
    return 48 * 1024 * 1024, 24 * 1024 * 1024   # v7x: 64 MiB physical VMEM


def _padded_bytes_3d(tn, c, tm, dtype):
    """Real VMEM footprint of a (tn, c, tm) block incl. sublane/lane padding."""
    it = jnp.dtype(dtype).itemsize
    return tn * _round_up(c, _sublane_mult(dtype)) * _round_up(tm, 128) * it


def _pick_nc_m_tiles(N, C, M, dtype, block_budget_bytes):
    """Pick (tn, tm) with tn | N, tm | M (tm lane-aligned when M allows) such that the
    padded block footprint stays within block_budget_bytes."""
    it = jnp.dtype(dtype).itemsize
    cpad = _round_up(C, _sublane_mult(dtype))
    if M % 128 == 0 and M > 128:
        max_lanes = max(128, (block_budget_bytes // (cpad * it) // 128) * 128)
        tm = min(M, max_lanes)
        while M % tm != 0:
            tm -= 128
    else:
        # Full last dim: legal for any M (block dim == full array dim).
        # TODO(synk): a huge, non-128-aligned M is not tiled further here.
        tm = M
    blk1 = max(1, _padded_bytes_3d(1, C, tm, dtype))
    tn = max(1, min(N, block_budget_bytes // blk1))
    while N % tn != 0:
        tn -= 1
    return tn, tm


def _pick_row_tile(R, L, dtype, block_budget_bytes):
    """Row tile for the fused instance-norm path (dtype-aware sublane rounding)."""
    row_bytes = _round_up(L, 128) * jnp.dtype(dtype).itemsize
    max_rows = block_budget_bytes // max(1, row_bytes)
    if max_rows >= R:
        return R
    mult = _sublane_mult(dtype)
    tr = (max_rows // mult) * mult
    return tr if tr >= mult else None


def _pick_rows_2d(N, row_bytes, block_budget_bytes, dtype):
    max_rows = block_budget_bytes // max(1, row_bytes)
    if max_rows >= N:
        return N
    mult = _sublane_mult(dtype)
    return max(mult, (max_rows // mult) * mult)


# ---------------------------------------------------------------------------
# Kernels
# ---------------------------------------------------------------------------
def _rownorm_kernel(x_ref, o_ref, *, eps, inv_l):
    """Instance norm: every row of the (tr, L) block is a full reduction group.
    Subtract-mean (two-pass-in-VMEM) variance: robust and the residual is reused."""
    x = x_ref[...].astype(jnp.float32)
    mean = jnp.sum(x, axis=-1, keepdims=True) * inv_l
    d = x - mean
    var = jnp.sum(d * d, axis=-1, keepdims=True) * inv_l
    o_ref[...] = (d * lax.rsqrt(var + eps)).astype(o_ref.dtype)


def _channel_fused_kernel(x_ref, gamma_ref, beta_ref, o_ref, *, eps, inv_count):
    """Whole-tensor (N, C, M) batch norm in one VMEM-resident pass."""
    x = x_ref[...].astype(jnp.float32)                                   # (N, C, M)
    mean = jnp.sum(jnp.sum(x, axis=0, keepdims=True), axis=2, keepdims=True) * inv_count
    d = x - mean
    var = jnp.sum(jnp.sum(d * d, axis=0, keepdims=True), axis=2, keepdims=True) * inv_count
    scale = lax.rsqrt(var + eps) * gamma_ref[...]                        # (1, C, 1)
    shift = beta_ref[...] - mean * scale
    o_ref[...] = (x * scale + shift).astype(o_ref.dtype)


def _bn_partial_stats_kernel(x_ref, psum_ref, psq_ref):
    """Per-(grid-tile) partial per-channel sum / sumsq.  Every tile owns its own output
    block -> both grid axes can be 'parallel' (megacore-safe, no resident accumulator)."""
    x = x_ref[...].astype(jnp.float32)                  # (tn, C, tm)
    part = jnp.sum(x, axis=0)                           # (C, tm)   cheap leading-dim adds
    part_sq = jnp.sum(x * x, axis=0)
    s = jnp.sum(part, axis=-1)[None, :]                 # (1, C)
    sq = jnp.sum(part_sq, axis=-1)[None, :]
    psum_ref[...] = jnp.broadcast_to(s, psum_ref.shape)      # (1, 8, C) slab
    psq_ref[...] = jnp.broadcast_to(sq, psq_ref.shape)


def _affine_apply_kernel(x_ref, scale_ref, shift_ref, o_ref):
    """y = x * scale[c] + shift[c] on a (tn, C, tm) block; scale/shift are (1, C, 1)
    so no lane->sublane relayout is needed per step."""
    x = x_ref[...].astype(jnp.float32)
    o_ref[...] = (x * scale_ref[...] + shift_ref[...]).astype(o_ref.dtype)


def _colnorm_fused_kernel(x_ref, gamma_ref, beta_ref, o_ref, *, eps, inv_n):
    """BatchNorm1d on a whole (N, C) tensor (C on lanes)."""
    x = x_ref[...].astype(jnp.float32)                  # (N, C)
    mean = jnp.sum(x, axis=0, keepdims=True) * inv_n    # (1, C)
    d = x - mean
    var = jnp.sum(d * d, axis=0, keepdims=True) * inv_n
    scale = lax.rsqrt(var + eps) * gamma_ref[...]
    shift = beta_ref[...] - mean * scale
    o_ref[...] = (x * scale + shift).astype(o_ref.dtype)


def _col_partial_stats_kernel(x_ref, psum_ref, psq_ref, *, n_rows, tn):
    """Partial column sums for an (N, C) tensor; cdiv grid with in-kernel row masking."""
    i = pl.program_id(0)
    x = x_ref[...].astype(jnp.float32)                  # (tn, C)
    row = lax.broadcasted_iota(jnp.int32, x.shape, 0) + i * tn
    x = jnp.where(row < n_rows, x, 0.0)
    s = jnp.sum(x, axis=0)[None, :]                     # (1, C)
    sq = jnp.sum(x * x, axis=0)[None, :]
    psum_ref[...] = jnp.broadcast_to(s, psum_ref.shape)   # (1, 8, C)
    psq_ref[...] = jnp.broadcast_to(sq, psq_ref.shape)


def _col_apply_kernel(x_ref, scale_ref, shift_ref, o_ref):
    x = x_ref[...].astype(jnp.float32)                  # (tn, C)
    o_ref[...] = (x * scale_ref[...] + shift_ref[...]).astype(o_ref.dtype)


# ---------------------------------------------------------------------------
# Instance norm (in2d / in1d): fused row-norm
# ---------------------------------------------------------------------------
def _rownorm(x2, eps):
    R, L = x2.shape
    dt = x2.dtype
    vmem_limit, pipe_budget = _vmem_budgets()
    tr = _pick_row_tile(R, L, dt, pipe_budget // 6)
    if tr is None:
        # Rows longer than the VMEM budget: fall back to the channel path treating each
        # row as its own channel (tiles the reduction axis).
        y3 = _channel_norm(x2.reshape(1, R, L),
                           jnp.ones((R,), jnp.float32),
                           jnp.zeros((R,), jnp.float32), eps)
        return y3.reshape(R, L)

    kernel = functools.partial(_rownorm_kernel, eps=eps, inv_l=1.0 / float(L))
    return pl.pallas_call(
        kernel,
        out_shape=jax.ShapeDtypeStruct((R, L), dt),
        grid=(pl.cdiv(R, tr),),
        in_specs=[pl.BlockSpec((tr, L), lambda i: (i, 0))],
        out_specs=pl.BlockSpec((tr, L), lambda i: (i, 0)),
        compiler_params=pltpu.CompilerParams(
            dimension_semantics=("parallel",),
            vmem_limit_bytes=vmem_limit),
    )(x2)


# ---------------------------------------------------------------------------
# Batch norm over (N, C, M): fused fast path or megacore-parallel two-pass
# ---------------------------------------------------------------------------
def _channel_norm_two_pass(x3, gamma, beta, eps, vmem_limit, pipe_budget):
    N, C, M = x3.shape
    dt = x3.dtype

    # ---- Pass 1: partial stats, fully "parallel" grid (shards across v7x's 2 TCs). ----
    # Sized for input-only traffic (outputs are tiny (8, C) slabs).
    tn_s, tm_s = _pick_nc_m_tiles(N, C, M, dt, pipe_budget // 4)
    gn, gm = N // tn_s, M // tm_s
    psum, psq = pl.pallas_call(
        _bn_partial_stats_kernel,
        out_shape=(jax.ShapeDtypeStruct((gn * gm, 8, C), jnp.float32),
                   jax.ShapeDtypeStruct((gn * gm, 8, C), jnp.float32)),
        grid=(gn, gm),
        in_specs=[pl.BlockSpec((tn_s, C, tm_s), lambda i, j: (i, 0, j))],
        out_specs=(pl.BlockSpec((1, 8, C), lambda i, j: (i * gm + j, 0, 0)),
                   pl.BlockSpec((1, 8, C), lambda i, j: (i * gm + j, 0, 0))),
        compiler_params=pltpu.CompilerParams(
            dimension_semantics=("parallel", "parallel"),
            vmem_limit_bytes=vmem_limit),
    )(x3)

    # ---- Tiny combine in JAX ((C,)-sized math). ----
    inv_count = 1.0 / float(N * M)
    total = jnp.sum(psum[:, 0, :], axis=0)
    total_sq = jnp.sum(psq[:, 0, :], axis=0)
    mean = total * inv_count
    # Single-pass E[x^2]-E[x]^2 keeps HBM traffic at one read; clamp guards the
    # cancellation-to-negative case.  All accumulation is f32.
    var = jnp.maximum(total_sq * inv_count - mean * mean, 0.0)
    scale = lax.rsqrt(var + eps) * gamma.astype(jnp.float32).reshape(C)
    shift = beta.astype(jnp.float32).reshape(C) - mean * scale

    # ---- Pass 2: y = x*scale[c] + shift[c], fully "parallel". ----
    tn_a, tm_a = _pick_nc_m_tiles(N, C, M, dt, pipe_budget // 6)
    return pl.pallas_call(
        _affine_apply_kernel,
        out_shape=jax.ShapeDtypeStruct((N, C, M), dt),
        grid=(N // tn_a, M // tm_a),
        in_specs=[pl.BlockSpec((tn_a, C, tm_a), lambda i, j: (i, 0, j)),
                  pl.BlockSpec((1, C, 1), lambda i, j: (0, 0, 0)),
                  pl.BlockSpec((1, C, 1), lambda i, j: (0, 0, 0))],
        out_specs=pl.BlockSpec((tn_a, C, tm_a), lambda i, j: (i, 0, j)),
        compiler_params=pltpu.CompilerParams(
            dimension_semantics=("parallel", "parallel"),
            vmem_limit_bytes=vmem_limit),
    )(x3, scale.reshape(1, C, 1), shift.reshape(1, C, 1))


def _channel_norm(x3, gamma, beta, eps):
    N, C, M = x3.shape
    dt = x3.dtype
    vmem_limit, pipe_budget = _vmem_budgets()

    in_bytes = _padded_bytes_3d(N, C, M, dt)
    f32_bytes = _padded_bytes_3d(N, C, M, jnp.float32)
    if 4 * in_bytes + 4 * f32_bytes <= vmem_limit:
        # Fused fast path: 1 HBM read + 1 write, subtract-mean variance in VMEM.
        kernel = functools.partial(_channel_fused_kernel, eps=eps,
                                   inv_count=1.0 / float(N * M))
        gamma3 = gamma.reshape(1, C, 1).astype(jnp.float32)
        beta3 = beta.reshape(1, C, 1).astype(jnp.float32)
        return pl.pallas_call(
            kernel,
            out_shape=jax.ShapeDtypeStruct((N, C, M), dt),
            grid=(1,),
            in_specs=[pl.BlockSpec((N, C, M), lambda i: (0, 0, 0)),
                      pl.BlockSpec((1, C, 1), lambda i: (0, 0, 0)),
                      pl.BlockSpec((1, C, 1), lambda i: (0, 0, 0))],
            out_specs=pl.BlockSpec((N, C, M), lambda i: (0, 0, 0)),
            compiler_params=pltpu.CompilerParams(
                dimension_semantics=("arbitrary",),
                vmem_limit_bytes=vmem_limit),
        )(x3, gamma3, beta3)

    return _channel_norm_two_pass(x3, gamma, beta, eps, vmem_limit, pipe_budget)


# ---------------------------------------------------------------------------
# BatchNorm1d with (N, C) input: dedicated lane-dense path (C on lanes)
# ---------------------------------------------------------------------------
def _colnorm_2d_two_pass(x2, gamma, beta, eps, vmem_limit, pipe_budget):
    N, C = x2.shape
    dt = x2.dtype
    row_bytes = _round_up(C, 128) * jnp.dtype(dt).itemsize

    # Pass 1: partial column sums, cdiv grid + in-kernel masking (no divisor hunting).
    tn_s = _pick_rows_2d(N, row_bytes, pipe_budget // 4, dt)
    g_s = pl.cdiv(N, tn_s)
    stats_kernel = functools.partial(_col_partial_stats_kernel, n_rows=N, tn=tn_s)
    psum, psq = pl.pallas_call(
        stats_kernel,
        out_shape=(jax.ShapeDtypeStruct((g_s, 8, C), jnp.float32),
                   jax.ShapeDtypeStruct((g_s, 8, C), jnp.float32)),
        grid=(g_s,),
        in_specs=[pl.BlockSpec((tn_s, C), lambda i: (i, 0))],
        out_specs=(pl.BlockSpec((1, 8, C), lambda i: (i, 0, 0)),
                   pl.BlockSpec((1, 8, C), lambda i: (i, 0, 0))),
        compiler_params=pltpu.CompilerParams(
            dimension_semantics=("parallel",),
            vmem_limit_bytes=vmem_limit),
    )(x2)

    inv_n = 1.0 / float(N)
    total = jnp.sum(psum[:, 0, :], axis=0)
    total_sq = jnp.sum(psq[:, 0, :], axis=0)
    mean = total * inv_n
    var = jnp.maximum(total_sq * inv_n - mean * mean, 0.0)
    scale = lax.rsqrt(var + eps) * gamma.astype(jnp.float32).reshape(C)
    shift = beta.astype(jnp.float32).reshape(C) - mean * scale

    # Pass 2: apply (row-local, so the padded tail rows are simply dropped on store).
    tn_a = _pick_rows_2d(N, row_bytes, pipe_budget // 6, dt)
    g_a = pl.cdiv(N, tn_a)
    return pl.pallas_call(
        _col_apply_kernel,
        out_shape=jax.ShapeDtypeStruct((N, C), dt),
        grid=(g_a,),
        in_specs=[pl.BlockSpec((tn_a, C), lambda i: (i, 0)),
                  pl.BlockSpec((1, C), lambda i: (0, 0)),
                  pl.BlockSpec((1, C), lambda i: (0, 0))],
        out_specs=pl.BlockSpec((tn_a, C), lambda i: (i, 0)),
        compiler_params=pltpu.CompilerParams(
            dimension_semantics=("parallel",),
            vmem_limit_bytes=vmem_limit),
    )(x2, scale.reshape(1, C), shift.reshape(1, C))


def _colnorm_2d(x2, gamma, beta, eps):
    N, C = x2.shape
    dt = x2.dtype
    vmem_limit, pipe_budget = _vmem_budgets()

    def _pad2(dtype):
        it = jnp.dtype(dtype).itemsize
        return _round_up(N, _sublane_mult(dtype)) * _round_up(C, 128) * it

    if 4 * _pad2(dt) + 4 * _pad2(jnp.float32) <= vmem_limit:
        kernel = functools.partial(_colnorm_fused_kernel, eps=eps, inv_n=1.0 / float(N))
        return pl.pallas_call(
            kernel,
            out_shape=jax.ShapeDtypeStruct((N, C), dt),
            grid=(1,),
            in_specs=[pl.BlockSpec((N, C), lambda i: (0, 0)),
                      pl.BlockSpec((1, C), lambda i: (0, 0)),
                      pl.BlockSpec((1, C), lambda i: (0, 0))],
            out_specs=pl.BlockSpec((N, C), lambda i: (0, 0)),
            compiler_params=pltpu.CompilerParams(
                dimension_semantics=("arbitrary",),
                vmem_limit_bytes=vmem_limit),
        )(x2, gamma.reshape(1, C).astype(jnp.float32),
          beta.reshape(1, C).astype(jnp.float32))

    return _colnorm_2d_two_pass(x2, gamma, beta, eps, vmem_limit, pipe_budget)


# ---------------------------------------------------------------------------
# Public forward pass (matches NormalizationLayer semantics)
# ---------------------------------------------------------------------------
def normalization_layer(x, norm_type, gamma=None, beta=None, eps=_EPS):
    """Training-mode (biased, batch) statistics for bn*; InstanceNorm is non-affine."""
    if norm_type == 'bn2d':
        N, C, H, W = x.shape
        gamma = jnp.ones((C,), jnp.float32) if gamma is None else gamma
        beta = jnp.zeros((C,), jnp.float32) if beta is None else beta
        return _channel_norm(x.reshape(N, C, H * W), gamma, beta, eps).reshape(x.shape)
    elif norm_type == 'in2d':
        N, C, H, W = x.shape
        return _rownorm(x.reshape(N * C, H * W), eps).reshape(x.shape)
    elif norm_type == 'bn1d':
        if x.ndim == 2:                     # (N, C) input: dedicated lane-dense path
            N, C = x.shape
            gamma = jnp.ones((C,), jnp.float32) if gamma is None else gamma
            beta = jnp.zeros((C,), jnp.float32) if beta is None else beta
            return _colnorm_2d(x, gamma, beta, eps)
        N, C, L = x.shape
        gamma = jnp.ones((C,), jnp.float32) if gamma is None else gamma
        beta = jnp.zeros((C,), jnp.float32) if beta is None else beta
        return _channel_norm(x, gamma, beta, eps)
    elif norm_type == 'in1d':
        N, C, L = x.shape
        return _rownorm(x.reshape(N * C, L), eps).reshape(x.shape)
    elif norm_type == 'none':
        # nn.Module uses `lambda x: x * 1.0`: a no-op for float inputs -> no kernel.
        return x
    else:
        raise NotImplementedError(
            '[INFO] The Normalization layer %s is not implemented !' % norm_type)


# ---------------------------------------------------------------------------
# Pure-JAX references (correctness checks)
# ---------------------------------------------------------------------------
def _ref_bn2d(x, gamma, beta, eps=_EPS):
    mean = jnp.mean(x, axis=(0, 2, 3), keepdims=True)
    var = jnp.mean((x - mean) ** 2, axis=(0, 2, 3), keepdims=True)
    return (x - mean) / jnp.sqrt(var + eps) * gamma.reshape(1, -1, 1, 1) \
        + beta.reshape(1, -1, 1, 1)


def _ref_in2d(x, eps=_EPS):
    mean = jnp.mean(x, axis=(2, 3), keepdims=True)
    var = jnp.mean((x - mean) ** 2, axis=(2, 3), keepdims=True)
    return (x - mean) / jnp.sqrt(var + eps)


def _ref_bn1d(x, gamma, beta, eps=_EPS):
    mean = jnp.mean(x, axis=(0, 2), keepdims=True)
    var = jnp.mean((x - mean) ** 2, axis=(0, 2), keepdims=True)
    return (x - mean) / jnp.sqrt(var + eps) * gamma.reshape(1, -1, 1) \
        + beta.reshape(1, -1, 1)


def _ref_bn1d_2d(x, gamma, beta, eps=_EPS):
    mean = jnp.mean(x, axis=0, keepdims=True)
    var = jnp.mean((x - mean) ** 2, axis=0, keepdims=True)
    return (x - mean) / jnp.sqrt(var + eps) * gamma.reshape(1, -1) + beta.reshape(1, -1)


def _ref_in1d(x, eps=_EPS):
    mean = jnp.mean(x, axis=2, keepdims=True)
    var = jnp.mean((x - mean) ** 2, axis=2, keepdims=True)
    return (x - mean) / jnp.sqrt(var + eps)


if __name__ == "__main__":
    key = jax.random.PRNGKey(0)
    k1, k2, k3 = jax.random.split(key, 3)

    # 2-D case: NCHW = (2, 4, 16, 16)
    x4 = jax.random.normal(k1, (2, 4, 16, 16), jnp.float32)
    C4 = x4.shape[1]
    gamma4 = jnp.ones((C4,), jnp.float32)     # PyTorch BatchNorm init: weight=1, bias=0
    beta4 = jnp.zeros((C4,), jnp.float32)

    y_bn2d = jax.block_until_ready(normalization_layer(x4, 'bn2d', gamma4, beta4))
    y_in2d = jax.block_until_ready(normalization_layer(x4, 'in2d'))
    y_none = jax.block_until_ready(normalization_layer(x4, 'none'))

    # 1-D case: NCL = (2, 4, 128)
    x3 = jax.random.normal(k2, (2, 4, 128), jnp.float32)
    y_bn1d = jax.block_until_ready(normalization_layer(x3, 'bn1d'))
    y_in1d = jax.block_until_ready(normalization_layer(x3, 'in1d'))

    # BatchNorm1d with (N, C) input (dedicated lane-dense path)
    x2 = jax.random.normal(k3, (8, 32), jnp.float32)
    gamma2 = jnp.ones((32,), jnp.float32)
    beta2 = jnp.zeros((32,), jnp.float32)
    y_bn1d_2d = jax.block_until_ready(normalization_layer(x2, 'bn1d', gamma2, beta2))

    # Also exercise the large-tensor two-pass paths (megacore-parallel partial stats)
    # directly at small shapes so they compile and are correctness-checked as well.
    vmem_limit, pipe_budget = _vmem_budgets()
    y_bn2d_2p = jax.block_until_ready(
        _channel_norm_two_pass(x4.reshape(2, C4, 16 * 16), gamma4, beta4, _EPS,
                               vmem_limit, pipe_budget)).reshape(x4.shape)
    y_bn1d_2d_2p = jax.block_until_ready(
        _colnorm_2d_two_pass(x2, gamma2, beta2, _EPS, vmem_limit, pipe_budget))

    # Sanity checks against pure-JAX references.
    assert jnp.allclose(y_bn2d, _ref_bn2d(x4, gamma4, beta4), atol=1e-4, rtol=1e-4)
    assert jnp.allclose(y_bn2d_2p, _ref_bn2d(x4, gamma4, beta4), atol=1e-4, rtol=1e-4)
    assert jnp.allclose(y_in2d, _ref_in2d(x4), atol=1e-4, rtol=1e-4)
    assert jnp.allclose(y_none, x4)
    assert jnp.allclose(y_bn1d, _ref_bn1d(x3, jnp.ones((4,)), jnp.zeros((4,))),
                        atol=1e-4, rtol=1e-4)
    assert jnp.allclose(y_in1d, _ref_in1d(x3), atol=1e-4, rtol=1e-4)
    assert jnp.allclose(y_bn1d_2d, _ref_bn1d_2d(x2, gamma2, beta2), atol=1e-4, rtol=1e-4)
    assert jnp.allclose(y_bn1d_2d_2p, _ref_bn1d_2d(x2, gamma2, beta2),
                        atol=1e-4, rtol=1e-4)

    print("KERNEL_OK")
</pallas_src>

<mosaic_0001>
module attributes {stable_mosaic.version = 11 : i64} {
  func.func @_channel_fused_kernel(%arg0: i32, %arg1: memref<2x4x256xf32, #tpu.memory_space<vmem>>, %arg2: memref<1x4x1xf32, #tpu.memory_space<vmem>>, %arg3: memref<1x4x1xf32, #tpu.memory_space<vmem>>, %arg4: memref<2x4x256xf32, #tpu.memory_space<vmem>>) attributes {dimension_semantics = [#tpu.dimension_semantics<arbitrary>], iteration_bounds = array<i64: 1>, scalar_prefetch = 0 : i64, scratch_operands = 0 : i64, tpu.core_type = #tpu.core_type<tc>, window_params = [{pipeline_mode = #tpu.pipeline_mode<synchronous>, transform_indices = @transform_0, window_bounds = array<i64: 2, 4, 256>}, {pipeline_mode = #tpu.pipeline_mode<synchronous>, transform_indices = @transform_1, window_bounds = array<i64: 1, 4, 1>}, {pipeline_mode = #tpu.pipeline_mode<synchronous>, transform_indices = @transform_2, window_bounds = array<i64: 1, 4, 1>}, {pipeline_mode = #tpu.pipeline_mode<synchronous>, transform_indices = @transform_3, window_bounds = array<i64: 2, 4, 256>}]} {
    %c0 = arith.constant 0 : index
    %c0_0 = arith.constant 0 : index
    %c0_1 = arith.constant 0 : index
    %0 = vector.load %arg1[%c0, %c0_0, %c0_1] : memref<2x4x256xf32, #tpu.memory_space<vmem>>, vector<2x4x256xf32>
    %cst = arith.constant dense<0.000000e+00> : vector<4x256xf32>
    %1 = vector.multi_reduction <add>, %0, %cst [0] : vector<2x4x256xf32> to vector<4x256xf32>
    %2 = vector.shape_cast %1 : vector<4x256xf32> to vector<1x4x256xf32>
    %cst_2 = arith.constant dense<0.000000e+00> : vector<1x4xf32>
    %3 = vector.multi_reduction <add>, %2, %cst_2 [2] : vector<1x4x256xf32> to vector<1x4xf32>
    %4 = vector.shape_cast %3 : vector<1x4xf32> to vector<1x4x1xf32>
    %cst_3 = arith.constant 0.001953125 : f32
    %5 = vector.broadcast %cst_3 : f32 to vector<1x4x1xf32>
    %6 = arith.mulf %4, %5 : vector<1x4x1xf32>
    %7 = vector.broadcast %6 : vector<1x4x1xf32> to vector<2x4x256xf32>
    %8 = arith.subf %0, %7 : vector<2x4x256xf32>
    %9 = arith.mulf %8, %8 : vector<2x4x256xf32>
    %cst_4 = arith.constant dense<0.000000e+00> : vector<4x256xf32>
    %10 = vector.multi_reduction <add>, %9, %cst_4 [0] : vector<2x4x256xf32> to vector<4x256xf32>
    %11 = vector.shape_cast %10 : vector<4x256xf32> to vector<1x4x256xf32>
    %cst_5 = arith.constant dense<0.000000e+00> : vector<1x4xf32>
    %12 = vector.multi_reduction <add>, %11, %cst_5 [2] : vector<1x4x256xf32> to vector<1x4xf32>
    %13 = vector.shape_cast %12 : vector<1x4xf32> to vector<1x4x1xf32>
    %cst_6 = arith.constant 0.001953125 : f32
    %14 = vector.broadcast %cst_6 : f32 to vector<1x4x1xf32>
    %15 = arith.mulf %13, %14 : vector<1x4x1xf32>
    %cst_7 = arith.constant 9.99999974E-6 : f32
    %16 = vector.broadcast %cst_7 : f32 to vector<1x4x1xf32>
    %17 = arith.addf %15, %16 : vector<1x4x1xf32>
    %18 = math.rsqrt %17 : vector<1x4x1xf32>
    %c0_8 = arith.constant 0 : index
    %c0_9 = arith.constant 0 : index
    %c0_10 = arith.constant 0 : index
    %19 = vector.load %arg2[%c0_8, %c0_9, %c0_10] : memref<1x4x1xf32, #tpu.memory_space<vmem>>, vector<1x4x1xf32>
    %20 = arith.mulf %18, %19 : vector<1x4x1xf32>
    %c0_11 = arith.constant 0 : index
    %c0_12 = arith.constant 0 : index
    %c0_13 = arith.constant 0 : index
    %21 = vector.load %arg3[%c0_11, %c0_12, %c0_13] : memref<1x4x1xf32, #tpu.memory_space<vmem>>, vector<1x4x1xf32>
    %22 = arith.mulf %6, %20 : vector<1x4x1xf32>
    %23 = arith.subf %21, %22 : vector<1x4x1xf32>
    %24 = vector.broadcast %20 : vector<1x4x1xf32> to vector<2x4x256xf32>
    %25 = arith.mulf %0, %24 : vector<2x4x256xf32>
    %26 = vector.broadcast %23 : vector<1x4x1xf32> to vector<2x4x256xf32>
    %27 = arith.addf %25, %26 : vector<2x4x256xf32>
    %c0_14 = arith.constant 0 : index
    %c0_15 = arith.constant 0 : index
    %c0_16 = arith.constant 0 : index
    %28 = vector.load %arg4[%c0_14, %c0_15, %c0_16] : memref<2x4x256xf32, #tpu.memory_space<vmem>>, vector<2x4x256xf32>
    tpu.vector_store %arg4[%c0_14, %c0_15, %c0_16], %27 {strides = array<i32>} : memref<2x4x256xf32, #tpu.memory_space<vmem>>, vector<2x4x256xf32>,
    return
  }
  func.func @transform_0(%arg0: i32) -> (i32, i32, i32) {
    %c0_i32 = arith.constant 0 : i32
    %c0_i32_0 = arith.constant 0 : i32
    %c0_i32_1 = arith.constant 0 : i32
    %c0_i32_2 = arith.constant 0 : i32
    return %c0_i32, %c0_i32_0, %c0_i32_1 : i32, i32, i32
  }
  func.func @transform_1(%arg0: i32) -> (i32, i32, i32) {
    %c0_i32 = arith.constant 0 : i32
    %c0_i32_0 = arith.constant 0 : i32
    %c0_i32_1 = arith.constant 0 : i32
    %c0_i32_2 = arith.constant 0 : i32
    return %c0_i32, %c0_i32_0, %c0_i32_1 : i32, i32, i32
  }
  func.func @transform_2(%arg0: i32) -> (i32, i32, i32) {
    %c0_i32 = arith.constant 0 : i32
    %c0_i32_0 = arith.constant 0 : i32
    %c0_i32_1 = arith.constant 0 : i32
    %c0_i32_2 = arith.constant 0 : i32
    return %c0_i32, %c0_i32_0, %c0_i32_1 : i32, i32, i32
  }
  func.func @transform_3(%arg0: i32) -> (i32, i32, i32) {
    %c0_i32 = arith.constant 0 : i32
    %c0_i32_0 = arith.constant 0 : i32
    %c0_i32_1 = arith.constant 0 : i32
    %c0_i32_2 = arith.constant 0 : i32
    return %c0_i32, %c0_i32_0, %c0_i32_1 : i32, i32, i32
  }
}

</mosaic_0001>

<bundles_post_ra>
// kernel: tpu_custom_call.1
= control target key start
LH: loop header
LB: loop body
LE: loop exit
PB: predicated region body
PF: predicated region fallthrough
CT: control target
= control target key end

     0   :  { %8 = vsyncpa [#allocation3], 0  ;;  %s269_s0 = inlined_call_operand.hbm [shape: f32[2,4,256], index: 0, kind: input, shape index: {}]   ;;  %s270_s1 = inlined_call_operand.vmem [shape: f32[1,4,1], index: 1, kind: input, shape index: {}]   ;;  %s271_s2 = inlined_call_operand.vmem [shape: f32[1,4,1], index: 2, kind: input, shape index: {}]   ;;  %s272_s3 = inlined_call_operand.hbm [shape: f32[2,4,256], index: 3, kind: output, shape index: {}]  }
   0x1   :  { %9 = vsyncpa [#allocation4], 0  ;;  %s195_s12 = smov [#allocation2]   ;;  %s147_s16 = scalar_lea.hbm %s269_s0, 256 }
   0x2   :  { %s15_s13 = sshll.u32 %s195_s12, 4  ;;  %p148_p0 = scmp.ne.s32.totalorder %s269_s0, %s147_s16  ;;  %s16_s13 = int_to_ptr.vmem [resolvable:$true] %s15_s13 }
   0x3   :  { %p151_p1 = scmp.lt.u32.totalorder %s147_s16, %s269_s0 }
   0x5   :  { %p153_p2 = pnand %p151_p1, %p148_p0 }
   0x7   :  { %156 = shalt.err (!%p153_p2)
}
   0x8   :  { %s157_s21 = scalar_lea.vmem %s16_s13, 256  ;;  %p162_p4 = scmp.lt.s32.totalorder %s16_s13, %s16_s13 }
   0x9   :  { %p158_p3 = scmp.ne.s32.totalorder %s16_s13, %s157_s21  ;;  %p163_p5 = scmp.lt.s32.totalorder %s157_s21, %s157_s21 }
   0xb   :  { %p164_p6 = por %p163_p5, %p162_p4 }
   0xd   :  { %p165_p7 = pnand %p164_p6, %p158_p3 }
   0xf   :  { %168 = shalt.err (!%p165_p7)
}
  0x10   :  { %s196_s22 = smov 128   ;;  %s197_s23 = smov 8  }
  0x11   :  { %21 = dma.hbm_to_vmem [thread:$0]  %s269_s0, 256, %s16_s13, [#allocation3], %s196_s22, %s196_s22, %s197_s23  }
  0x12   :  { %191 = dma.done.wait [#allocation3], 256  }
  0x13   :  { %192 = vsyncadd [#allocation3], 4294967040  ;;  %vm37_vm0 = vcmask 1043456   ;;  %v29_v0 = vld [vmem:[#allocation2] sm:$0xff]  ;;  %v30_v1 = vld [vmem:[#allocation2 + $0x8] sm:$0xff]  ;;  %v54_v15 = vlaneseq  ;;  %v199_v37 = vmov 0  }
  0x14   :  { %v33_v2 = vcombine.high %v29_v0, %v29_v0  ;;  %v34_v3 = vcombine.high %v30_v1, %v30_v1  ;;  %v38_v4 = vsel %vm37_vm0, %v29_v0, 0.0  ;;  %v39_v5 = vsel %vm37_vm0, %v30_v1, 0.0  ;;  %141 = vset.pattern.permute.xlu1 %v199_v37  ;;  %142 = vset.pattern.permute.xlu0 %v199_v37  ;;  %v83_v41 = vld [vmem:[%s270_s1] sm:$0xf]  ;;  %s200_s29 = smov [#allocation5]  }
  0x15   :  { %v40_v6 = vadd.f32 %v39_v5, %v38_v4  ;;  %v198_v13 = vmov 839922192   ;;  %v55_v17 = vshrl.u32 %v54_v15, 7  ;;  %v85_v44 = vld [vmem:[%s271_s2] sm:$0xf]  ;;  %s123_s30 = sshll.u32 %s200_s29, 4  ;;  %s124_s30 = int_to_ptr.vmem [resolvable:$true] %s123_s30 }
  0x16   :  { %v41_v7 = vsel %vm37_vm0, %v33_v2, 0.0  ;;  %v42_v8 = vsel %vm37_vm0, %v34_v3, 0.0  ;;  %v52_v14 = vunpack.c.l.s4 %v198_v13  ;;  %s169_s1 = scalar_lea.vmem %s124_s30, 256  ;;  %p174_p9 = scmp.lt.s32.totalorder %s124_s30, %s124_s30 }
  0x17   :  { %v43_v9 = vadd.f32 %v42_v8, %v41_v7  ;;  %v44_v10 = vsel %vm37_vm0, %v40_v6, 0.0  ;;  %p170_p8 = scmp.ne.s32.totalorder %s124_s30, %s169_s1  ;;  %p175_p10 = scmp.lt.s32.totalorder %s169_s1, %s169_s1 }
  0x18   :  { %v53_v16 = vunpack.c.0.s8 %v52_v14 }
  0x19   :  { %v45_v11 = vsel %vm37_vm0, %v43_v9, 0.0  ;;  %p176_p11 = por %p175_p10, %p174_p9 }
  0x1a   :  { %v46_v12 = vadd.f32 %v45_v11, %v44_v10  ;;  %v56_v18 = vsub.s32 %v53_v16, %v55_v17 }
  0x1b   :  { %p177_p12 = pnand %p176_p11, %p170_p8 }
  0x1c   :  { %47 = vadd.xlane.f32.xlu0 %v46_v12 }
  0xa9   :  { %v48_v19 = vpop.xlane.xlu0 %47 }
  0xaa   :  { %v49_v20 = vmul.f32 0.001953125, %v48_v19 }
  0xac   :  { %v57_v21 = vrot.slane %v49_v20, %v56_v18 }
  0xae   :  { %v59_v22 = vsub.f32 %v29_v0, %v57_v21  ;;  %v60_v23 = vsub.f32 %v30_v1, %v57_v21 }
  0xb0   :  { %v61_v24 = vmul.f32 %v59_v22, %v59_v22  ;;  %v62_v25 = vmul.f32 %v60_v23, %v60_v23 }
  0xb2   :  { %v65_v26 = vcombine.high %v61_v24, %v61_v24  ;;  %v66_v27 = vcombine.high %v62_v25, %v62_v25  ;;  %v69_v28 = vsel %vm37_vm0, %v61_v24, 0.0  ;;  %v70_v29 = vsel %vm37_vm0, %v62_v25, 0.0 }
  0xb3   :  { %v71_v30 = vadd.f32 %v70_v29, %v69_v28 }
  0xb4   :  { %v72_v31 = vsel %vm37_vm0, %v65_v26, 0.0  ;;  %v73_v32 = vsel %vm37_vm0, %v66_v27, 0.0 }
  0xb5   :  { %v74_v33 = vadd.f32 %v73_v32, %v72_v31  ;;  %v75_v34 = vsel %vm37_vm0, %v71_v30, 0.0 }
  0xb7   :  { %v76_v35 = vsel %vm37_vm0, %v74_v33, 0.0 }
  0xb8   :  { %v77_v36 = vadd.f32 %v76_v35, %v75_v34 }
  0xba   :  { %78 = vadd.xlane.f32.xlu0 %v77_v36 }
 0x147   :  { %v79_v38 = vpop.xlane.xlu0 %78 }
 0x148   :  { %v80_v39 = vmul.f32 0.001953125, %v79_v38 }
 0x14a   :  { %v81_v40 = vadd.f32 1e-05, %v80_v39 }
 0x14c   :  { %145 = vrsqrt.f32 %v81_v40 }
 0x156   :  { %v146_v42 = vpop.eup %145 }
 0x157   :  { %v84_v43 = vmul.f32 %v146_v42, %v83_v41 }
 0x159   :  { %90 = vperm.xlu1 %141, %v84_v43   ;;  %v86_v45 = vmul.f32 %v84_v43, %v49_v20 }
 0x15b   :  { %v87_v46 = vsub.f32 %v85_v44, %v86_v45 }
 0x15d   :  { %104 = vperm.xlu1 %141, %v87_v46  }
 0x1d8   :  { %v91_v47 = vpop.permute.xlu1 %90 }
 0x1d9   :  { %v98_v48 = vrot.slane %v91_v47, %v56_v18 }
 0x1db   :  { %v100_v50 = vmul.f32 %v98_v48, %v29_v0  ;;  %v101_v51 = vmul.f32 %v98_v48, %v30_v1 }
 0x1dc   :  { %v105_v49 = vpop.permute.xlu1 %104 }
 0x1dd   :  { %v112_v52 = vrot.slane %v105_v49, %v56_v18 }
 0x1df   :  { %v114_v53 = vadd.f32 %v112_v52, %v100_v50  ;;  %v115_v54 = vadd.f32 %v112_v52, %v101_v51 }
 0x1e1   :  { %116 = vst [vmem:[#allocation5] sm:$0xff] %v114_v53  ;;  %117 = vst [vmem:[#allocation5 + $0x8] sm:$0xff] %v115_v54 }
 0x1e2   :  { %180 = shalt.err (!%p177_p12)
}
 0x1e3   :  { %s181_s5 = scalar_lea.hbm %s272_s3, 256 }
 0x1e4   :  { %p182_p13 = scmp.ne.s32.totalorder %s272_s3, %s181_s5  ;;  %p185_p0 = scmp.lt.u32.totalorder %s181_s5, %s272_s3 }
 0x1e6   :  { %p187_p1 = pnand %p185_p0, %p182_p13 }
 0x1e8   :  { %190 = shalt.err (!%p187_p1)
}
 0x1e9   :  { %129 = dma.vmem_to_hbm [thread:$0]  %s124_s30, 256, %s272_s3, [#allocation4], %s196_s22, %s196_s22, %s197_s23  }
 0x1ea   :  { %193 = dma.done.wait [#allocation4], 256  }
 0x1eb   :  { %194 = vsyncadd [#allocation4], 4294967040 }
 0x1ec   :  { %133 = vsyncpa [#allocation3], 1 }
 0x1ed   :  { %134 = vsyncpa [#allocation4], 1 }

</bundles_post_ra>
